<compile_context>
chip_gen: v5e
topology: v5e:2x2
jax: 0.10.0
libtpu: 0.0.40
codegen_flags: <defaults>
</compile_context>

<pallas_src>
import functools

import jax
import jax.numpy as jnp
from jax import lax
from jax.experimental import pallas as pl
from jax.experimental.pallas import tpu as pltpu


def _round_up(n: int, m: int) -> int:
    return (n + m - 1) // m * m


def _layer_norm_epilogue(y, g, beta, d_in_actual, eps):
    """f32 LayerNorm over the last axis, masked to the first d_in_actual cols."""
    d_in_pad = y.shape[-1]
    inv_d = jnp.float32(1.0 / d_in_actual)
    # Padded columns of y are exactly zero by construction, so the sum used for
    # the mean is already correct; the variance needs an explicit mask.
    mean = jnp.sum(y, axis=-1, keepdims=True) * inv_d
    if d_in_pad == d_in_actual:
        diff = y - mean
    else:
        col = lax.broadcasted_iota(jnp.int32, (1, d_in_pad), 1)
        valid = (col < d_in_actual).astype(jnp.float32)
        diff = (y - mean) * valid
    var = jnp.sum(diff * diff, axis=-1, keepdims=True) * inv_d
    return (y - mean) * lax.rsqrt(var + eps) * g + beta


def _ffn_kernel_resident(x_ref, w1_ref, b1_ref, w2_ref, b2_ref, g_ref, beta_ref,
                         o_ref, *, d_in_actual, eps, matmul_dtype):
    """grid = (row_tiles,). Full bf16 W1/W2 stay VMEM-resident (constant maps)."""
    x = x_ref[...]
    xm = x.astype(matmul_dtype)
    h = jnp.dot(xm, w1_ref[...], preferred_element_type=jnp.float32)
    h = jnp.maximum(h + b1_ref[...], 0.0)
    y = jnp.dot(h.astype(matmul_dtype), w2_ref[...],
                preferred_element_type=jnp.float32)
    # TODO(synk): nn.Dropout(0.1) is identity in eval mode; not applied.
    y = y + b2_ref[...] + x.astype(jnp.float32)
    o_ref[...] = _layer_norm_epilogue(y, g_ref[...], beta_ref[...],
                                      d_in_actual, eps).astype(o_ref.dtype)


def _ffn_kernel_ktiled(x_ref, w1_ref, b1_ref, w2_ref, b2_ref, g_ref, beta_ref,
                       o_ref, *scratch, d_in_actual, eps, matmul_dtype):
    """grid = (row_tiles, hid_tiles). hid axis is a reduction (f32 accumulator)."""
    if len(scratch) == 2:
        xbf_ref, acc_ref = scratch
    else:
        (acc_ref,) = scratch
        xbf_ref = None
    k = pl.program_id(1)
    nk = pl.num_programs(1)

    @pl.when(k == 0)
    def _():
        acc_ref[...] = jnp.zeros_like(acc_ref)
        if xbf_ref is not None:
            # Hoisted cast: the x tile is VMEM-resident across k, cast it once.
            xbf_ref[...] = x_ref[...].astype(matmul_dtype)

    xm = xbf_ref[...] if xbf_ref is not None else x_ref[...]
    h = jnp.dot(xm, w1_ref[...], preferred_element_type=jnp.float32)
    h = jnp.maximum(h + b1_ref[...], 0.0)
    acc_ref[...] += jnp.dot(h.astype(matmul_dtype), w2_ref[...],
                            preferred_element_type=jnp.float32)

    @pl.when(k == nk - 1)
    def _():
        # TODO(synk): nn.Dropout(0.1) is identity in eval mode; not applied.
        y = acc_ref[...] + b2_ref[...] + x_ref[...].astype(jnp.float32)
        o_ref[...] = _layer_norm_epilogue(y, g_ref[...], beta_ref[...],
                                          d_in_actual, eps).astype(o_ref.dtype)


def _pad2d(a, rows, cols, dtype):
    a = a.astype(dtype)
    if a.shape == (rows, cols):
        return a
    return jnp.zeros((rows, cols), dtype).at[:a.shape[0], :a.shape[1]].set(a)


def _pad_vec(v, cols, dtype):
    v = v.astype(dtype).reshape(1, -1)
    if v.shape[1] == cols:
        return v
    return jnp.zeros((1, cols), dtype).at[:, :v.shape[1]].set(v)


def feed_forward(x, w1, b1, w2, b2, gamma, beta, *,
                 row_tile=512, hid_tile=512, eps=1e-6,
                 matmul_dtype=jnp.bfloat16, _force_k_tiling=False):
    """x: (..., d_in). w1: (d_in, d_hid), w2: (d_hid, d_in). Output dtype = x.dtype."""
    d_in = x.shape[-1]
    d_hid = w1.shape[1]
    lead_shape = x.shape[:-1]
    x2d = x.reshape(-1, d_in)
    n_rows = x2d.shape[0]

    dt = x.dtype
    isz = jnp.dtype(dt).itemsize
    osz = isz
    wsz = jnp.dtype(matmul_dtype).itemsize

    # Lane-dense feature dims (multiples of 128).
    d_in_p = _round_up(d_in, 128)
    d_hid_p = _round_up(d_hid, 128)

    # Per-generation VMEM budget (v7x: 64 MiB physical; v5e/v6e: 128 MiB).
    try:
        vmem_cap = int(getattr(pltpu.get_tpu_info(), "vmem_capacity_bytes",
                               64 * 1024 * 1024))
    except Exception:  # conservative fallback
        vmem_cap = 64 * 1024 * 1024
    budget = int(0.70 * vmem_cap)

    small_param_bytes = 2 * (d_hid_p + 3 * d_in_p) * 4 * 2  # biases / LN params

    def vmem_resident(rt_):
        return (2 * rt_ * d_in_p * isz              # x tile, double-buffered
                + 2 * rt_ * d_in_p * osz            # out tile, double-buffered
                + 2 * 2 * d_in_p * d_hid_p * wsz    # W1 + W2 (bf16, 2 buffers)
                + rt_ * d_hid_p * 4                 # live f32 hidden activations
                + small_param_bytes)

    def vmem_ktiled(rt_, ht_):
        xbf = rt_ * d_in_p * wsz if dt != matmul_dtype else 0
        return (2 * rt_ * d_in_p * isz
                + xbf                               # hoisted bf16 x scratch
                + 2 * rt_ * d_in_p * osz
                + rt_ * d_in_p * 4                  # f32 accumulator
                + 2 * 2 * d_in_p * ht_ * wsz        # W1/W2 k-tiles, double-buffered
                + rt_ * ht_ * 4                     # live f32 hidden activations
                + small_param_bytes)

    # Adaptive row tile: big by default, clamped to the (sublane-padded) rows.
    rt = min(_round_up(row_tile, 8), _round_up(n_rows, 8))

    if not _force_k_tiling and vmem_resident(rt) <= budget:
        hid_tile_eff = d_hid_p                      # full weights VMEM-resident
    else:
        hid_tile_eff = min(_round_up(hid_tile, 128), d_hid_p)
        # Streaming weights: amortize the weight stream over more rows.
        if n_rows >= 1024:
            rt_big = min(1024, _round_up(n_rows, 8))
            if vmem_ktiled(rt_big, hid_tile_eff) <= budget:
                rt = rt_big
        while hid_tile_eff > 128 and vmem_ktiled(rt, hid_tile_eff) > budget:
            hid_tile_eff = _round_up(hid_tile_eff // 2, 128)
        while rt > 8 and vmem_ktiled(rt, hid_tile_eff) > budget:
            rt = _round_up(rt // 2, 8)

    n_k = pl.cdiv(d_hid_p, hid_tile_eff)
    d_hid_pp = n_k * hid_tile_eff
    single_k = (n_k == 1) and not _force_k_tiling

    # Megacore (v7x: 2 TCs): keep the "parallel" row axis at >= 2 tiles.
    if rt >= 16 and _round_up(n_rows, rt) // rt < 2:
        rt = _round_up(rt // 2, 8)
    n_rows_p = _round_up(n_rows, rt)
    n_row_tiles = n_rows_p // rt

    vmem_est = vmem_resident(rt) if single_k else vmem_ktiled(rt, hid_tile_eff)

    # Zero-pad only what actually needs padding; aligned arrays pass through.
    # Weights are cast to bf16 here, once, so the kernel streams half the bytes
    # and does no per-step casts.
    # TODO(synk): in a real model, pre-cast/pad weights once at load time
    # instead of per forward call.
    x_p = _pad2d(x2d, n_rows_p, d_in_p, dt)
    w1_p = _pad2d(w1, d_in_p, d_hid_pp, matmul_dtype)
    w2_p = _pad2d(w2, d_hid_pp, d_in_p, matmul_dtype)
    b1_p = _pad_vec(b1, d_hid_pp, jnp.float32)
    b2_p = _pad_vec(b2, d_in_p, jnp.float32)
    g_p = _pad_vec(gamma, d_in_p, jnp.float32)
    beta_p = _pad_vec(beta, d_in_p, jnp.float32)

    # Advisory cost estimate with the real weight re-streaming behaviour.
    flops = 4 * n_rows_p * d_in_p * d_hid_pp
    w_bytes = 2 * d_in_p * d_hid_pp * wsz
    bytes_accessed = (n_rows_p * d_in_p * (isz + osz)
                      + (w_bytes if single_k else w_bytes * n_row_tiles)
                      + (d_hid_pp + 3 * d_in_p) * 4)
    cost = pl.CostEstimate(flops=flops, transcendentals=n_rows_p,
                           bytes_accessed=bytes_accessed)

    compiler_kwargs = dict(
        dimension_semantics=("parallel",) if single_k
        else ("parallel", "arbitrary"))
    # Raise the scoped VMEM limit whenever the footprint may exceed the default
    # (v5e default is only 16 MiB); clamp well under physical VMEM so the
    # request is always valid on v7x (64 MiB physical).
    if vmem_est > 12 * 1024 * 1024:
        compiler_kwargs["vmem_limit_bytes"] = min(
            max(int(vmem_est * 1.3), 32 * 1024 * 1024),
            int(0.85 * vmem_cap))

    if single_k:
        kernel = functools.partial(_ffn_kernel_resident, d_in_actual=d_in,
                                   eps=eps, matmul_dtype=matmul_dtype)
        grid_spec = pltpu.PrefetchScalarGridSpec(
            num_scalar_prefetch=0,
            grid=(n_row_tiles,),
            in_specs=[
                pl.BlockSpec((rt, d_in_p), lambda i: (i, 0)),          # x rows
                pl.BlockSpec((d_in_p, d_hid_pp), lambda i: (0, 0)),    # W1 (resident)
                pl.BlockSpec((1, d_hid_pp), lambda i: (0, 0)),         # b1
                pl.BlockSpec((d_hid_pp, d_in_p), lambda i: (0, 0)),    # W2 (resident)
                pl.BlockSpec((1, d_in_p), lambda i: (0, 0)),           # b2
                pl.BlockSpec((1, d_in_p), lambda i: (0, 0)),           # gamma
                pl.BlockSpec((1, d_in_p), lambda i: (0, 0)),           # beta
            ],
            out_specs=pl.BlockSpec((rt, d_in_p), lambda i: (i, 0)),
            scratch_shapes=[],
        )
    else:
        kernel = functools.partial(_ffn_kernel_ktiled, d_in_actual=d_in,
                                   eps=eps, matmul_dtype=matmul_dtype)
        scratch = []
        if dt != matmul_dtype:
            scratch.append(pltpu.VMEM((rt, d_in_p), matmul_dtype))     # hoisted x cast
        scratch.append(pltpu.VMEM((rt, d_in_p), jnp.float32))          # f32 accumulator
        grid_spec = pltpu.PrefetchScalarGridSpec(
            num_scalar_prefetch=0,
            grid=(n_row_tiles, n_k),
            in_specs=[
                pl.BlockSpec((rt, d_in_p), lambda i, k: (i, 0)),            # x rows
                pl.BlockSpec((d_in_p, hid_tile_eff), lambda i, k: (0, k)),  # W1 k-tile
                pl.BlockSpec((1, hid_tile_eff), lambda i, k: (0, k)),       # b1 k-tile
                pl.BlockSpec((hid_tile_eff, d_in_p), lambda i, k: (k, 0)),  # W2 k-tile
                pl.BlockSpec((1, d_in_p), lambda i, k: (0, 0)),             # b2
                pl.BlockSpec((1, d_in_p), lambda i, k: (0, 0)),             # gamma
                pl.BlockSpec((1, d_in_p), lambda i, k: (0, 0)),             # beta
            ],
            out_specs=pl.BlockSpec((rt, d_in_p), lambda i, k: (i, 0)),
            scratch_shapes=scratch,
        )

    out2d = pl.pallas_call(
        kernel,
        out_shape=jax.ShapeDtypeStruct((n_rows_p, d_in_p), dt),
        grid_spec=grid_spec,
        compiler_params=pltpu.CompilerParams(**compiler_kwargs),
        cost_estimate=cost,
    )(x_p, w1_p, b1_p, w2_p, b2_p, g_p, beta_p)

    return out2d[:n_rows, :d_in].reshape(*lead_shape, d_in)


def _reference(x, w1, b1, w2, b2, gamma, beta, eps=1e-6):
    h = jnp.maximum(x @ w1 + b1, 0.0)
    y = h @ w2 + b2 + x
    mean = jnp.mean(y, axis=-1, keepdims=True)
    var = jnp.mean((y - mean) ** 2, axis=-1, keepdims=True)
    return (y - mean) * lax.rsqrt(var + eps) * gamma + beta


if __name__ == "__main__":
    # Small shapes implied by the module: sequence-of-features input.
    batch, seq, d_in, d_hid = 2, 8, 32, 64

    key = jax.random.PRNGKey(0)
    kx, k1, k2, k3, k4 = jax.random.split(key, 5)

    x = jax.random.normal(kx, (batch, seq, d_in), dtype=jnp.float32)

    # Deterministic synthetic parameters matching nn.Linear / nn.LayerNorm
    # shapes. PyTorch w_1.weight is (d_hid, d_in); we store the transpose
    # (d_in, d_hid) so the kernel computes x @ W1.
    w1 = jax.random.normal(k1, (d_in, d_hid), dtype=jnp.float32) / jnp.sqrt(d_in)
    b1 = jax.random.normal(k2, (d_hid,), dtype=jnp.float32) * 0.01
    w2 = jax.random.normal(k3, (d_hid, d_in), dtype=jnp.float32) / jnp.sqrt(d_hid)
    b2 = jax.random.normal(k4, (d_in,), dtype=jnp.float32) * 0.01
    gamma = jnp.ones((d_in,), dtype=jnp.float32)   # nn.LayerNorm default weight
    beta = jnp.zeros((d_in,), dtype=jnp.float32)   # nn.LayerNorm default bias

    # Resident-weights (single-k) path.
    out = feed_forward(x, w1, b1, w2, b2, gamma, beta)
    jax.block_until_ready(out)
    assert out.shape == x.shape and out.dtype == x.dtype
    ref = _reference(x, w1, b1, w2, b2, gamma, beta)
    max_err = float(jnp.max(jnp.abs(out - ref)))
    assert max_err < 0.1, f"single-k max abs error {max_err}"

    # Also exercise the K-tiled reduction path (forced; d_hid2 -> 2 k-tiles).
    d_hid2 = 256
    k5, k6 = jax.random.split(k1)
    w1b = jax.random.normal(k5, (d_in, d_hid2), dtype=jnp.float32) / jnp.sqrt(d_in)
    b1b = jnp.zeros((d_hid2,), dtype=jnp.float32)
    w2b = jax.random.normal(k6, (d_hid2, d_in), dtype=jnp.float32) / jnp.sqrt(d_hid2)
    out_kt = feed_forward(x, w1b, b1b, w2b, b2, gamma, beta,
                          hid_tile=128, _force_k_tiling=True)
    jax.block_until_ready(out_kt)
    ref_kt = _reference(x, w1b, b1b, w2b, b2, gamma, beta)
    max_err_kt = float(jnp.max(jnp.abs(out_kt - ref_kt)))
    assert max_err_kt < 0.1, f"k-tiled max abs error {max_err_kt}"

    print("KERNEL_OK")
</pallas_src>

<mosaic_0001>
module attributes {stable_mosaic.version = 11 : i64} {
  func.func @_ffn_kernel_resident(%arg0: i32, %arg1: memref<8x128xf32, #tpu.memory_space<vmem>>, %arg2: memref<128x128xbf16, #tpu.memory_space<vmem>>, %arg3: memref<1x128xf32, #tpu.memory_space<vmem>>, %arg4: memref<128x128xbf16, #tpu.memory_space<vmem>>, %arg5: memref<1x128xf32, #tpu.memory_space<vmem>>, %arg6: memref<1x128xf32, #tpu.memory_space<vmem>>, %arg7: memref<1x128xf32, #tpu.memory_space<vmem>>, %arg8: memref<8x128xf32, #tpu.memory_space<vmem>>) attributes {dimension_semantics = [#tpu.dimension_semantics<parallel>], iteration_bounds = array<i64: 2>, scalar_prefetch = 0 : i64, scratch_operands = 0 : i64, tpu.core_type = #tpu.core_type<tc>, window_params = [{transform_indices = @transform_0, window_bounds = array<i64: 8, 128>}, {pipeline_mode = #tpu.pipeline_mode<synchronous>, transform_indices = @transform_1, window_bounds = array<i64: 128, 128>}, {pipeline_mode = #tpu.pipeline_mode<synchronous>, transform_indices = @transform_2, window_bounds = array<i64: 1, 128>}, {pipeline_mode = #tpu.pipeline_mode<synchronous>, transform_indices = @transform_3, window_bounds = array<i64: 128, 128>}, {pipeline_mode = #tpu.pipeline_mode<synchronous>, transform_indices = @transform_4, window_bounds = array<i64: 1, 128>}, {pipeline_mode = #tpu.pipeline_mode<synchronous>, transform_indices = @transform_5, window_bounds = array<i64: 1, 128>}, {pipeline_mode = #tpu.pipeline_mode<synchronous>, transform_indices = @transform_6, window_bounds = array<i64: 1, 128>}, {transform_indices = @transform_7, window_bounds = array<i64: 8, 128>}]} {
    %c0 = arith.constant 0 : index
    %c0_0 = arith.constant 0 : index
    %0 = vector.load %arg1[%c0, %c0_0] : memref<8x128xf32, #tpu.memory_space<vmem>>, vector<8x128xf32>
    %1 = arith.truncf %0 : vector<8x128xf32> to vector<8x128xbf16>
    %c0_1 = arith.constant 0 : index
    %c0_2 = arith.constant 0 : index
    %2 = vector.load %arg2[%c0_1, %c0_2] : memref<128x128xbf16, #tpu.memory_space<vmem>>, vector<128x128xbf16>
    %cst = arith.constant dense<0.000000e+00> : vector<8x128xf32>
    %3 = tpu.matmul %1, %2, %cst {dimension_numbers = #tpu.dot_dimension_numbers<[1], [0], [0], [1], [0, 0, 1, 1], [], []>} : vector<8x128xbf16>, vector<128x128xbf16>, vector<8x128xf32> -> vector<8x128xf32>
    %c0_3 = arith.constant 0 : index
    %c0_4 = arith.constant 0 : index
    %4 = vector.load %arg3[%c0_3, %c0_4] : memref<1x128xf32, #tpu.memory_space<vmem>>, vector<1x128xf32>
    %5 = vector.broadcast %4 : vector<1x128xf32> to vector<8x128xf32>
    %6 = arith.addf %3, %5 : vector<8x128xf32>
    %cst_5 = arith.constant 0.000000e+00 : f32
    %7 = vector.broadcast %cst_5 : f32 to vector<8x128xf32>
    %8 = arith.maximumf %6, %7 : vector<8x128xf32>
    %9 = arith.truncf %8 : vector<8x128xf32> to vector<8x128xbf16>
    %c0_6 = arith.constant 0 : index
    %c0_7 = arith.constant 0 : index
    %10 = vector.load %arg4[%c0_6, %c0_7] : memref<128x128xbf16, #tpu.memory_space<vmem>>, vector<128x128xbf16>
    %cst_8 = arith.constant dense<0.000000e+00> : vector<8x128xf32>
    %11 = tpu.matmul %9, %10, %cst_8 {dimension_numbers = #tpu.dot_dimension_numbers<[1], [0], [0], [1], [0, 0, 1, 1], [], []>} : vector<8x128xbf16>, vector<128x128xbf16>, vector<8x128xf32> -> vector<8x128xf32>
    %c0_9 = arith.constant 0 : index
    %c0_10 = arith.constant 0 : index
    %12 = vector.load %arg5[%c0_9, %c0_10] : memref<1x128xf32, #tpu.memory_space<vmem>>, vector<1x128xf32>
    %13 = vector.broadcast %12 : vector<1x128xf32> to vector<8x128xf32>
    %14 = arith.addf %11, %13 : vector<8x128xf32>
    %15 = arith.addf %14, %0 : vector<8x128xf32>
    %c0_11 = arith.constant 0 : index
    %c0_12 = arith.constant 0 : index
    %16 = vector.load %arg6[%c0_11, %c0_12] : memref<1x128xf32, #tpu.memory_space<vmem>>, vector<1x128xf32>
    %c0_13 = arith.constant 0 : index
    %c0_14 = arith.constant 0 : index
    %17 = vector.load %arg7[%c0_13, %c0_14] : memref<1x128xf32, #tpu.memory_space<vmem>>, vector<1x128xf32>
    %cst_15 = arith.constant dense<0.000000e+00> : vector<8xf32>
    %18 = vector.multi_reduction <add>, %15, %cst_15 [1] : vector<8x128xf32> to vector<8xf32>
    %19 = vector.shape_cast %18 : vector<8xf32> to vector<8x1xf32>
    %cst_16 = arith.constant 3.125000e-02 : f32
    %20 = vector.broadcast %cst_16 : f32 to vector<8x1xf32>
    %21 = arith.mulf %19, %20 : vector<8x1xf32>
    %22 = tpu.iota {dimensions = array<i32: 1>} : vector<1x128xi32>
    %c32_i32 = arith.constant 32 : i32
    %23 = vector.broadcast %c32_i32 : i32 to vector<1x128xi32>
    %24 = arith.cmpi slt, %22, %23 : vector<1x128xi32>
    %25 = arith.extui %24 : vector<1x128xi1> to vector<1x128xi32>
    %26 = arith.sitofp %25 : vector<1x128xi32> to vector<1x128xf32>
    %27 = vector.broadcast %21 : vector<8x1xf32> to vector<8x128xf32>
    %28 = arith.subf %15, %27 : vector<8x128xf32>
    %29 = vector.broadcast %26 : vector<1x128xf32> to vector<8x128xf32>
    %30 = arith.mulf %28, %29 : vector<8x128xf32>
    %31 = arith.mulf %30, %30 : vector<8x128xf32>
    %cst_17 = arith.constant dense<0.000000e+00> : vector<8xf32>
    %32 = vector.multi_reduction <add>, %31, %cst_17 [1] : vector<8x128xf32> to vector<8xf32>
    %33 = vector.shape_cast %32 : vector<8xf32> to vector<8x1xf32>
    %cst_18 = arith.constant 3.125000e-02 : f32
    %34 = vector.broadcast %cst_18 : f32 to vector<8x1xf32>
    %35 = arith.mulf %33, %34 : vector<8x1xf32>
    %36 = vector.broadcast %21 : vector<8x1xf32> to vector<8x128xf32>
    %37 = arith.subf %15, %36 : vector<8x128xf32>
    %cst_19 = arith.constant 9.99999997E-7 : f32
    %38 = vector.broadcast %cst_19 : f32 to vector<8x1xf32>
    %39 = arith.addf %35, %38 : vector<8x1xf32>
    %40 = math.rsqrt %39 : vector<8x1xf32>
    %41 = vector.broadcast %40 : vector<8x1xf32> to vector<8x128xf32>
    %42 = arith.mulf %37, %41 : vector<8x128xf32>
    %43 = vector.broadcast %16 : vector<1x128xf32> to vector<8x128xf32>
    %44 = arith.mulf %42, %43 : vector<8x128xf32>
    %45 = vector.broadcast %17 : vector<1x128xf32> to vector<8x128xf32>
    %46 = arith.addf %44, %45 : vector<8x128xf32>
    %c0_20 = arith.constant 0 : index
    %c0_21 = arith.constant 0 : index
    %47 = vector.load %arg8[%c0_20, %c0_21] : memref<8x128xf32, #tpu.memory_space<vmem>>, vector<8x128xf32>
    tpu.vector_store %arg8[%c0_20, %c0_21], %46 {strides = array<i32>} : memref<8x128xf32, #tpu.memory_space<vmem>>, vector<8x128xf32>,
    return
  }
  func.func @transform_0(%arg0: i32) -> (i32, i32) {
    %c0_i32 = arith.constant 0 : i32
    %c0_i32_0 = arith.constant 0 : i32
    return %arg0, %c0_i32 : i32, i32
  }
  func.func @transform_1(%arg0: i32) -> (i32, i32) {
    %c0_i32 = arith.constant 0 : i32
    %c0_i32_0 = arith.constant 0 : i32
    %c0_i32_1 = arith.constant 0 : i32
    return %c0_i32, %c0_i32_0 : i32, i32
  }
  func.func @transform_2(%arg0: i32) -> (i32, i32) {
    %c0_i32 = arith.constant 0 : i32
    %c0_i32_0 = arith.constant 0 : i32
    %c0_i32_1 = arith.constant 0 : i32
    return %c0_i32, %c0_i32_0 : i32, i32
  }
  func.func @transform_3(%arg0: i32) -> (i32, i32) {
    %c0_i32 = arith.constant 0 : i32
    %c0_i32_0 = arith.constant 0 : i32
    %c0_i32_1 = arith.constant 0 : i32
    return %c0_i32, %c0_i32_0 : i32, i32
  }
  func.func @transform_4(%arg0: i32) -> (i32, i32) {
    %c0_i32 = arith.constant 0 : i32
    %c0_i32_0 = arith.constant 0 : i32
    %c0_i32_1 = arith.constant 0 : i32
    return %c0_i32, %c0_i32_0 : i32, i32
  }
  func.func @transform_5(%arg0: i32) -> (i32, i32) {
    %c0_i32 = arith.constant 0 : i32
    %c0_i32_0 = arith.constant 0 : i32
    %c0_i32_1 = arith.constant 0 : i32
    return %c0_i32, %c0_i32_0 : i32, i32
  }
  func.func @transform_6(%arg0: i32) -> (i32, i32) {
    %c0_i32 = arith.constant 0 : i32
    %c0_i32_0 = arith.constant 0 : i32
    %c0_i32_1 = arith.constant 0 : i32
    return %c0_i32, %c0_i32_0 : i32, i32
  }
  func.func @transform_7(%arg0: i32) -> (i32, i32) {
    %c0_i32 = arith.constant 0 : i32
    %c0_i32_0 = arith.constant 0 : i32
    return %arg0, %c0_i32 : i32, i32
  }
}

</mosaic_0001>

<bundles_post_ra>
// kernel: tpu_custom_call.1
= control target key start
LH: loop header
LB: loop body
LE: loop exit
PB: predicated region body
PF: predicated region fallthrough
CT: control target
= control target key end

     0   :  { %s1182_s0 = inlined_call_operand.hbm [shape: f32[16,128], index: 0, kind: input, shape index: {}]   ;;  %s1183_s1 = inlined_call_operand.hbm [shape: bf16[128,128], index: 1, kind: input, shape index: {}]   ;;  %s1184_s2 = inlined_call_operand.vmem [shape: f32[1,128], index: 2, kind: input, shape index: {}]   ;;  %s1185_s3 = inlined_call_operand.hbm [shape: bf16[128,128], index: 3, kind: input, shape index: {}]   ;;  %s1186_s4 = inlined_call_operand.vmem [shape: f32[1,128], index: 4, kind: input, shape index: {}]   ;;  %s1187_s5 = inlined_call_operand.vmem [shape: f32[1,128], index: 5, kind: input, shape index: {}]   ;;  %s1188_s6 = inlined_call_operand.vmem [shape: f32[1,128], index: 6, kind: input, shape index: {}]   ;;  %s1189_s7 = inlined_call_operand.hbm [shape: f32[16,128], index: 7, kind: output, shape index: {}]  }
   0x1   :  { %1190 = sst [smem:[#allocation12_spill]] %s1183_s1 }
   0x2   :  { %1191 = sst [smem:[#allocation13_spill]] %s1185_s3 }
   0x3   :  { %12 = vsyncpa [#allocation3], 0 }
   0x4   :  { %14 = vsyncpa [#allocation3 + $0x1], 0 }
   0x5   :  { %15 = vsyncpa [#allocation6], 0 }
   0x6   :  { %16 = vsyncpa [#allocation4], 0 }
   0x7   :  { %18 = vsyncpa [#allocation4 + $0x1], 0  ;;  %s1018_s24 = smov 0   ;;  %s1020_s25 = smov 0  }
   0x8   :  { %s1022_s26 = smov 0   ;;  %s1024_s27 = smov 0  }
   0x9 LB: > { %s1192_s1 = sld [smem:[#allocation12_spill]]  ;;  %s1042_s8 = sadd.s32 4294967295, %s971_s27   ;;  %s971_s27 = sphi %s1024_s27, %s1204_s27   ;;  %s967_s26 = sphi %s1022_s26, %s1203_s26   ;;  %s963_s25 = sphi %s1020_s25, %s1202_s25   ;;  %s959_s24 = sphi %s1018_s24, %s1201_s24  }
   0xa   : > { %p639_p0 = scmp.ge.s32.totalorder %s971_s27, 1  ;;  %p45_p1 = scmp.eq.s32.totalorder %s1042_s8, 0 }
   0xb   : > { %p207_p2 = scmp.lt.s32.totalorder %s971_s27, 3  ;;  %s973_s10 = smov [#allocation5]  }
   0xc   : > { %s220_s11 = sshll.u32 %s973_s10, 4  ;;  %s1194_s3 = sld [smem:[#allocation13_spill]]  ;;  %s221_s11 = int_to_ptr.vmem [resolvable:$true] %s220_s11 }
   0xd   : > { %p1047_p3 = pnand %p639_p0, %p207_p2  ;;  %s974_s15 = smov [#allocation7]  }
   0xe   : > { %s237_s16 = sshll.u32 %s974_s15, 4  ;;  %s975_s17 = smov 64   ;;  %s238_s16 = int_to_ptr.vmem [resolvable:$true] %s237_s16 }
   0xf   : > { %s218_s30 = sshll.u32 %s1192_s1, 4  ;;  %p747_p4 = pneg %p1047_p3  ;;  %s219_s30 = int_to_ptr.hbm [resolvable:$true] %s218_s30 }
  0x10   : > { %s976_s18 = smov 4   ;;  %s638_s19 = sadd.s32 4294967294, %s971_s27  }
  0x11   : > { %p748_p6 = pnand %p747_p4, %p45_p1  ;;  %s1061_s20 = sadd.s32 1, %s971_s27  }
  0x12   : > { %s235_s14 = sshll.u32 %s1194_s3, 4  ;;  %s28_s21 = ssub.s32 %s971_s27, %s1061_s20  ;;  %s236_s14 = int_to_ptr.hbm [resolvable:$true] %s235_s14 }
  0x13   : > { %750 = dma.hbm_to_vmem [thread:$0]  (!%p748_p6), %s219_s30, 1024, %s221_s11, [#allocation6], %s975_s17, %s975_s17, %s976_s18  }
  0x14   : > { %753 = dma.hbm_to_vmem [thread:$0]  (!%p748_p6), %s236_s14, 1024, %s238_s16, [#allocation6], %s975_s17, %s975_s17, %s976_s18  }
  0x15   : > { %s31_s22 = sadd.s32 1, %s967_s26  ;;  %p29_p7 = scmp.eq.s32.totalorder %s28_s21, 0 }
  0x16   : > { %p38_p8 = scmp.ne.s32.totalorder %s967_s26, %s963_s25  ;;  %p39_p9 = scmp.eq.s32.totalorder %s971_s27, 0 }
  0x17   : > { %p44_p10 = scmp.ne.s32.totalorder %s963_s25, %s959_s24  ;;  %p194_p13 = scmp.eq.s32.totalorder %s1042_s8, 1 }
  0x18   : > { %s1072_s23 = scalar_select %p29_p7, %s967_s26, %s31_s22  }
  0x19   : > { %p1074_p11 = por %p39_p9, %p38_p8  ;;  %p1080_p12 = por %p45_p1, %p44_p10 }
  0x1a   : > { %p200_p0 = scmp.eq.s32.totalorder %s638_s19, 1  ;;  %p764_p2 = scmp.lt.s32.totalorder %s971_s27, 2 }
  0x1b   : > { %s260_s30 = sand.u32 1, %s967_s26   ;;  %p1087_p4 = por %p194_p13, %p38_p8 }
  0x1c   : > { %p1091_p6 = por %p200_p0, %p44_p10  ;;  %s643_s12 = sshll.u32 %s260_s30, 3 }
  0x1d   : > { %s644_s13 = sshll.u32 %s971_s27, 3  ;;  %s264_s17 = scalar_lea.vmem [#allocation2], %s643_s12 }
  0x1e   : > { %s268_s16 = scalar_lea.hbm %s1182_s0, %s644_s13  ;;  %s272_s18 = sshll.u32 %s264_s17, 4  ;;  %s273_s18 = int_to_ptr.vmem [resolvable:$true] %s272_s18 }
  0x1f   : > { %s270_s21 = sshll.u32 %s268_s16, 4  ;;  %p1101_p7 = pnand %p764_p2, %p1074_p11  ;;  %s271_s21 = int_to_ptr.hbm [resolvable:$true] %s270_s21 }
  0x20   : > { %s261_s22 = scalar_lea.sflag [#allocation3], %s260_s30  ;;  %s871_s1 = sshra.s32 %s271_s21, 4  ;;  %s872_s1 = int_to_ptr.hbm [resolvable:$true] %s871_s1 }
  0x21   : > { %s873_s3 = scalar_lea.hbm %s872_s1, 8  ;;  %p875_p9 = pneg %p1101_p7 }
  0x22   : > { %p874_p8 = scmp.ne.s32.totalorder %s872_s1, %s873_s3  ;;  %s878_s14 = scalar_lea.hbm %s1182_s0, 16 }
  0x23   : > { %p879_p11 = scmp.lt.s32.totalorder %s872_s1, %s1182_s0  ;;  %p880_p0 = scmp.lt.s32.totalorder %s878_s14, %s873_s3 }
  0x24   : > { %p876_p10 = pnand %p875_p9, %p874_p8 }
  0x25   : > { %p881_p2 = por %p880_p0, %p879_p11 }
  0x26   : > { %p877_p13 = pneg %p876_p10 }
  0x28   : > { %p882_p5 = pnand %p881_p2, %p877_p13 }
  0x2a   : > { %885 = shalt.err (!%p882_p5)
}
  0x2b   : > { %757 = dma.hbm_to_vmem [thread:$0]  (!%p1101_p7), %s271_s21, 128, %s273_s18, %s261_s22  }
  0x2c   : > { %281 = sbr.rel (%p1047_p3) target bundleno = 617 (0x269), region = 48  ;;  %s1118_s30 = sand.u32 (!%p1047_p3), 1, %s963_s25  }
  0x2d   : > { %s646_s16 = sshll.u32 (!%p1047_p3), %s1118_s30, 3  ;;  %s284_s17 = scalar_lea.sflag (!%p1047_p3), [#allocation3], %s1118_s30 }
  0x2e   : > { %s1124_s1 = scalar_lea.vmem (!%p1047_p3), [#allocation2], %s646_s16 }
  0x31   : > { %946 = dma.done.wait (%p1080_p12), %s284_s17, 128  }
  0x32   : > { %948 = vsyncadd (%p1080_p12), %s284_s17, 4294967168 }
  0x33   : > { %950 = dma.done.wait (%p45_p1), [#allocation6], 2048  }
  0x34   : > { %952 = vsyncadd (%p45_p1), [#allocation6], 4294965248  ;;  %v726_v0 = vld [vmem:[#allocation5 + $0x38] sm:$0xff]  ;;  %v725_v1 = vld [vmem:[#allocation5 + $0x30] sm:$0xff]  ;;  %v501_v29 = vlaneseq  ;;  %v977_v33 = vmov 0.0   ;;  %s716_s21 = sshll.u32 %s1042_s8, 3 }
  0x35   : > { %399 = vmatpush.bf16.msra.mxu0 %v726_v0  ;;  %v734_v2 = vld [vmem:[#allocation7 + $0x38] sm:$0xff]  ;;  %v733_v3 = vld [vmem:[#allocation7 + $0x30] sm:$0xff]  ;;  %v724_v4 = vld [vmem:[#allocation5 + $0x28] sm:$0xff]  ;;  %s544_s14 = scalar_lea.hbm %s1189_s7, %s716_s21  ;;  %s328_s8 = scalar_lea.vmem [#allocation8], %s646_s16 }
  0x36   : > { %482 = vmatpush.bf16.msra.mxu1 %v734_v2  ;;  %v732_v5 = vld [vmem:[#allocation7 + $0x28] sm:$0xff]  ;;  %v723_v6 = vld [vmem:[#allocation5 + $0x20] sm:$0xff]  ;;  %v722_v8 = vld [vmem:[#allocation5 + $0x18] sm:$0xff]  ;;  %v502_v30 = vand.u32 127, %v501_v29  ;;  %s546_s17 = sshll.u32 %s328_s8, 4  ;;  %s534_s3 = scalar_lea.sflag [#allocation4], %s1118_s30  ;;  %s547_s17 = int_to_ptr.vmem [resolvable:$true] %s546_s17 }
  0x37   : > { %v731_v7 = vld [vmem:[#allocation7 + $0x20] sm:$0xff]  ;;  %v730_v9 = vld [vmem:[#allocation7 + $0x18] sm:$0xff]  ;;  %v721_v10 = vld [vmem:[#allocation5 + $0x10] sm:$0xff]  ;;  %s921_s19 = scalar_lea.hbm %s1189_s7, 16 }
  0x38   : > { %v729_v11 = vld [vmem:[#allocation7 + $0x10] sm:$0xff]  ;;  %v720_v12 = vld [vmem:[#allocation5 + $0x8] sm:$0xff]  ;;  %v719_v13 = vld [vmem:[#allocation5] sm:$0xff]  ;;  %vm503_vm0 = vcmp.lt.s32.totalorder %v502_v30, 32 }
  0x39   : > { %400 = vmatpush.bf16.msra.mxu0 %v725_v1  ;;  %v329_v14 = vld [vmem:[%s1124_s1] sm:$0xff]  ;;  %v728_v16 = vld [vmem:[#allocation7 + $0x8] sm:$0xff]  ;;  %v727_v17 = vld [vmem:[#allocation7] sm:$0xff]  ;;  %v714_v34 = vsel %vm503_vm0, 1.0, %v977_v33  ;;  %s548_s1 = sshll.u32 %s544_s14, 4  ;;  %s549_s1 = int_to_ptr.hbm [resolvable:$true] %s548_s1 }
  0x3a   : > { %483 = vmatpush.bf16.msra.mxu1 %v733_v3  ;;  %v330_v15 = vpack.c.bf16 %v329_v14, %v329_v14  ;;  %v805_v18 = vld [vmem:[%s1184_s2] ss:$0 sm:$0xff]  ;;  %s915_s9 = sshra.s32 %s549_s1, 4  ;;  %s916_s9 = int_to_ptr.hbm [resolvable:$true] %s915_s9 }
  0x3b   : > { %v806_v24 = vld [vmem:[%s1186_s4] ss:$0 sm:$0xff]  ;;  %s917_s29 = scalar_lea.hbm %s916_s9, 8  ;;  %p922_p12 = scmp.lt.s32.totalorder %s916_s9, %s1189_s7 }
  0x3c   : > { %v807_v47 = vld [vmem:[%s1187_s5] ss:$0 sm:$0xff]  ;;  %p918_p1 = scmp.ne.s32.totalorder %s916_s9, %s917_s29  ;;  %p923_p7 = scmp.lt.s32.totalorder %s921_s19, %s917_s29 }
  0x3d   : > { %401 = vmatpush.bf16.msra.mxu0 %v724_v4  ;;  %v808_v50 = vld [vmem:[%s1188_s6] ss:$0 sm:$0xff] }
  0x3e   : > { %484 = vmatpush.bf16.msra.mxu1 %v732_v5  ;;  %p919_p3 = pnand %p918_p1, %p1087_p4  ;;  %p924_p8 = por %p923_p7, %p922_p12 }
  0x40   : > { %p920_p5 = pneg %p919_p3 }
  0x41   : > { %402 = vmatpush.bf16.msra.mxu0 %v723_v6 }
  0x42   : > { %485 = vmatpush.bf16.msra.mxu1 %v731_v7  ;;  %p925_p9 = pnand %p924_p8, %p920_p5 }
  0x45   : > { %403 = vmatpush.bf16.msra.mxu0 %v722_v8 }
  0x46   : > { %486 = vmatpush.bf16.msra.mxu1 %v730_v9 }
  0x49   : > { %404 = vmatpush.bf16.msra.mxu0 %v721_v10 }
  0x4a   : > { %487 = vmatpush.bf16.msra.mxu1 %v729_v11 }
  0x4d   : > { %405 = vmatpush.bf16.msra.mxu0 %v720_v12 }
  0x4e   : > { %488 = vmatpush.bf16.msra.mxu1 %v728_v16 }
  0x51   : > { %406 = vmatpush.bf16.msra.mxu0 %v719_v13 }
  0x52   : > { %489 = vmatpush.bf16.msra.mxu1 %v727_v17 }
  0x54   : > { %407 = vmatmul.bf16.vlgmr.msra.gmra.mxu0 %v330_v15 }
  0xd1   : > { %v408_v19 = vpop.f32.mrf.mxu0 }
  0xd2   : > { %v409_v20 = vadd.f32 %v805_v18, %v408_v19 }
  0xd4   : > { %v412_v21 = vmax.f32 %v409_v20, 0.0 }
  0xd6   : > { %v413_v22 = vpack.c.bf16 %v412_v21, %v412_v21 }
  0xd8   : > { %490 = vmatmul.bf16.vlgmr.msra.gmra.mxu1 %v413_v22 }
  0xd9   : > { %v410_v23 = vpop.f32.mrf.mxu0 }
 0x155   : > { %v491_v25 = vpop.f32.mrf.mxu1 }
 0x156   : > { %v492_v26 = vadd.f32 %v806_v24, %v491_v25 }
 0x158   : > { %v495_v27 = vadd.f32 %v492_v26, %v329_v14 }
 0x15a   : > { %498 = vadd.xlane.f32.xlu0 %v495_v27 }
 0x15d   : > { %v493_v28 = vpop.f32.mrf.mxu1 }
 0x1cd   : > { %v499_v31 = vpop.xlane.xlu0 %498 }
 0x1ce   : > { %v500_v32 = vmul.f32 0.03125, %v499_v31 }
 0x1d0   : > { %v506_v35 = vsub.f32 %v495_v27, %v500_v32 }
 0x1d2   : > { %v507_v36 = vmul.f32 %v714_v34, %v506_v35 }
 0x1d4   : > { %v508_v37 = vmul.f32 %v507_v36, %v507_v36 }
 0x1d6   : > { %509 = vadd.xlane.f32.xlu0 %v508_v37 }
 0x249   : > { %v510_v38 = vpop.xlane.xlu0 %509 }
 0x24a   : > { %v511_v39 = vmul.f32 0.03125, %v510_v38 }
 0x24c   : > { %v512_v40 = vadd.f32 1e-06, %v511_v39 }
 0x24e   : > { %809 = vrsqrt.f32 %v512_v40  ;;  %vm519_vm2 = vweird.f32 %v512_v40 }
 0x254   : > { %v810_v41 = vpop.eup %809 }
 0x255   : > { %v514_v42 = vmul.f32 %v810_v41, %v512_v40  ;;  %vm520_vm1 = vweird.f32 %v810_v41 }
 0x256   : > { %vm521_vm3 = vmor %vm519_vm2, %vm520_vm1 }
 0x257   : > { %v515_v43 = vmul.f32 %v810_v41, %v514_v42 }
 0x259   : > { %v516_v44 = vmul.f32 0.5, %v515_v43 }
 0x25b   : > { %v517_v45 = vsub.f32 1.5, %v516_v44 }
 0x25d   : > { %v518_v46 = vmul.f32 %v810_v41, %v517_v45 }
 0x25f   : > { %v522_v48 = vsel %vm521_vm3, %v810_v41, %v518_v46 }
 0x260   : > { %v523_v49 = vmul.f32 %v522_v48, %v506_v35 }
 0x262   : > { %v527_v51 = vmul.f32 %v807_v47, %v523_v49 }
 0x264   : > { %v531_v52 = vadd.f32 %v808_v50, %v527_v51 }
 0x266   : > { %532 = vst [vmem:[%s328_s8] sm:$0xff] %v531_v52 }
 0x267   : > { %928 = shalt.err (!%p925_p9)
}
 0x268   : > { %745 = dma.vmem_to_hbm [thread:$0]  (%p1087_p4), %s547_s17, 128, %s549_s1, %s534_s3  }
 0x269 PF: > { %s560_s30 = sand.u32 1, %s959_s24   ;;  %p1200_p10 = scmp.ge.s32.totalorder %s971_s27, 2 }
 0x26a   : > { %s561_s12 = scalar_lea.sflag [#allocation4], %s560_s30 }
 0x26b   : > { %p759_p13 = pnand %p1200_p10, %p1091_p6 }
 0x26d   : > { %p760_p11 = pneg %p759_p13 }
 0x26f   : > { %954 = dma.done.wait (%p760_p11), %s561_s12, 128  }
 0x270   : > { %956 = vsyncadd (%p760_p11), %s561_s12, 4294967168  ;;  %p21_p0 = scmp.ge.s32.totalorder %s1061_s20, 4   ;;  %s1201_s24 = smov %s963_s25 }
 0x271   : > { %s1202_s25 = smov %s967_s26  ;;  %s1203_s26 = smov %s1072_s23 }
 0x272   : > { %s1204_s27 = smov %s1061_s20  ;;  %23 = sbr.rel (!%p21_p0) target bundleno = 9 (0x9), region = 101 }
 0x277   :  { %567 = vsyncpa [#allocation3], 1 }
 0x278   :  { %569 = vsyncpa [#allocation3 + $0x1], 1 }
 0x279   :  { %570 = vsyncpa [#allocation6], 1 }
 0x27a   :  { %571 = vsyncpa [#allocation4], 1 }
 0x27b   :  { %573 = vsyncpa [#allocation4 + $0x1], 1 }

</bundles_post_ra>
